<compile_context>
chip_gen: v7x
topology: tpu7x:2x2x1
jax: 0.10.0
libtpu: 0.0.40
codegen_flags: <defaults>
</compile_context>

<pallas_src>
import functools

import jax
import jax.numpy as jnp
from jax.experimental import pallas as pl
from jax.experimental.pallas import tpu as pltpu


_LANE = 128
_SUBLANE = 8
_MAX_TILE = 512                        # bf16 512x512 adj tile = 512 KiB per buffer
_VMEM_LIMIT = 48 * 1024 * 1024         # explicit; safe on v5e/v6e (128 MiB) and v7x (64 MiB)
_X_RESIDENT_BYTES = 4 * 1024 * 1024    # keep x fully VMEM-resident up to this size


def _round_up(x, m):
    return ((x + m - 1) // m) * m


def _pad2d(a, rows, cols):
    r, c = a.shape
    return jnp.pad(a, ((0, rows - r), (0, cols - c)))


# ----------------------------------------------------------------------------
# Kernels
# ----------------------------------------------------------------------------
def gin_conv_kernel(adj_ref, x_ref, w1_ref, b1_ref, w2_ref, b2_ref, o_ref,
                    acc_ref, *, x_resident, tk):
    """One GINConv layer + outer ReLU, tiled over (row tiles, K tiles).

    adj tile: [TM, TK] bf16 of (A + I)
    x:        [N, F] f32 (resident) or [TK, F] f32 (streamed K-tile)
    w1: [F, H], b1: [1, H], w2: [H, H], b2: [1, H]  (full, f32, resident)
    out tile: [TM, H];  acc scratch: [TM, F] f32
    """
    k = pl.program_id(1)

    @pl.when(k == 0)
    def _():
        acc_ref[...] = jnp.zeros_like(acc_ref)

    if x_resident:
        # x stays in VMEM for the whole grid (block index never changes);
        # slice the K-chunk matching this adjacency tile.
        start = pl.multiple_of(k * tk, tk)
        x_blk = x_ref[pl.ds(start, tk), :]
    else:
        x_blk = x_ref[...]

    # (A + I) @ x, accumulated in f32.  Adjacency entries are exact small
    # integers in bf16; cast back to f32 so numerics match the f32 reference.
    acc_ref[...] += jnp.dot(
        adj_ref[...].astype(jnp.float32), x_blk,
        preferred_element_type=jnp.float32)

    @pl.when(k == pl.num_programs(1) - 1)
    def _():
        agg = acc_ref[...]
        h = jnp.dot(agg, w1_ref[...], preferred_element_type=jnp.float32) + b1_ref[...]
        h = jnp.maximum(h, 0.0)
        h = jnp.dot(h, w2_ref[...], preferred_element_type=jnp.float32) + b2_ref[...]
        o_ref[...] = jnp.maximum(h, 0.0)          # outer F.relu in GIN.forward


def pool_fc_kernel(pool_ref, x_ref, wf_ref, bf_ref, o_ref, acc_ref):
    """global_add_pool (pooling-matrix matmul, reduced over N tiles) + final fc.

    pool tile: [G, TK] bf16;  x tile: [TK, H] f32;  wf: [H, O];  bf: [1, O]
    out: [G, O];  acc scratch: [G, H] f32
    """
    k = pl.program_id(0)

    @pl.when(k == 0)
    def _():
        acc_ref[...] = jnp.zeros_like(acc_ref)

    acc_ref[...] += jnp.dot(
        pool_ref[...].astype(jnp.float32), x_ref[...],
        preferred_element_type=jnp.float32)

    @pl.when(k == pl.num_programs(0) - 1)
    def _():
        o_ref[...] = (
            jnp.dot(acc_ref[...], wf_ref[...], preferred_element_type=jnp.float32)
            + bf_ref[...])


# ----------------------------------------------------------------------------
# Wrappers
# ----------------------------------------------------------------------------
def gin_conv(adj, x, w1, b1, w2, b2, *, tm, tk):
    n_pad = adj.shape[0]
    f_pad = x.shape[1]
    h_pad = w1.shape[1]
    grid = (n_pad // tm, n_pad // tk)

    x_bytes = n_pad * f_pad * 4
    x_resident = x_bytes <= _X_RESIDENT_BYTES
    if x_resident:
        # Constant block index -> DMA'd once, stays in VMEM for all grid steps.
        x_spec = pl.BlockSpec((n_pad, f_pad), lambda i, k: (0, 0))
        x_traffic = x_bytes
    else:
        # Streamed: one K-tile per grid step (re-fetched per row tile).
        x_spec = pl.BlockSpec((tk, f_pad), lambda i, k: (k, 0))
        x_traffic = (n_pad // tm) * x_bytes

    flops = (2 * n_pad * n_pad * f_pad
             + 2 * n_pad * f_pad * h_pad
             + 2 * n_pad * h_pad * h_pad)
    bytes_accessed = (n_pad * n_pad * 2            # bf16 adjacency (dominant)
                      + x_traffic                  # node features
                      + (f_pad * h_pad + h_pad * h_pad + 2 * h_pad) * 4
                      + n_pad * h_pad * 4)         # output

    kernel = functools.partial(gin_conv_kernel, x_resident=x_resident, tk=tk)

    return pl.pallas_call(
        kernel,
        out_shape=jax.ShapeDtypeStruct((n_pad, h_pad), jnp.float32),
        grid_spec=pltpu.PrefetchScalarGridSpec(
            num_scalar_prefetch=0,
            grid=grid,
            in_specs=[
                pl.BlockSpec((tm, tk), lambda i, k: (i, k)),        # adjacency tile
                x_spec,                                             # x (resident or K-tile)
                pl.BlockSpec((f_pad, h_pad), lambda i, k: (0, 0)),  # w1 (resident)
                pl.BlockSpec((1, h_pad), lambda i, k: (0, 0)),      # b1
                pl.BlockSpec((h_pad, h_pad), lambda i, k: (0, 0)),  # w2
                pl.BlockSpec((1, h_pad), lambda i, k: (0, 0)),      # b2
            ],
            out_specs=pl.BlockSpec((tm, h_pad), lambda i, k: (i, 0)),
            scratch_shapes=[pltpu.VMEM((tm, f_pad), jnp.float32)],
        ),
        compiler_params=pltpu.CompilerParams(
            dimension_semantics=("parallel", "arbitrary"),
            vmem_limit_bytes=_VMEM_LIMIT),
        cost_estimate=pl.CostEstimate(
            flops=flops, transcendentals=0, bytes_accessed=bytes_accessed),
    )(adj, x, w1, b1, w2, b2)


def pool_fc(pool, x, wf, bf, *, tk):
    g_pad, n_pad = pool.shape
    h_pad = x.shape[1]
    o_pad = wf.shape[1]
    grid = (n_pad // tk,)

    flops = 2 * g_pad * n_pad * h_pad + 2 * g_pad * h_pad * o_pad
    bytes_accessed = (g_pad * n_pad * 2 + n_pad * h_pad * 4
                      + (h_pad * o_pad + o_pad) * 4 + g_pad * o_pad * 4)

    return pl.pallas_call(
        pool_fc_kernel,
        out_shape=jax.ShapeDtypeStruct((g_pad, o_pad), jnp.float32),
        grid_spec=pltpu.PrefetchScalarGridSpec(
            num_scalar_prefetch=0,
            grid=grid,
            in_specs=[
                pl.BlockSpec((g_pad, tk), lambda k: (0, k)),        # pool K-tile
                pl.BlockSpec((tk, h_pad), lambda k: (k, 0)),        # h K-tile
                pl.BlockSpec((h_pad, o_pad), lambda k: (0, 0)),     # wf (resident)
                pl.BlockSpec((1, o_pad), lambda k: (0, 0)),         # bf
            ],
            out_specs=pl.BlockSpec((g_pad, o_pad), lambda k: (0, 0)),
            scratch_shapes=[pltpu.VMEM((g_pad, h_pad), jnp.float32)],
        ),
        compiler_params=pltpu.CompilerParams(
            dimension_semantics=("arbitrary",),
            vmem_limit_bytes=_VMEM_LIMIT),
        cost_estimate=pl.CostEstimate(
            flops=flops, transcendentals=0, bytes_accessed=bytes_accessed),
    )(pool, x, wf, bf)


@functools.partial(jax.jit, static_argnames=("num_graphs",))
def gin_forward(params, x, edge_index, batch, num_graphs):
    """Full GIN forward.  x: [N, F_in] f32, edge_index: [2, E] i32, batch: [N] i32."""
    n, f_in = x.shape
    hidden = params["w1a"].shape[1]
    out_dim = params["wf"].shape[1]

    # Padded sizes: lane-dense feature dims, node/graph counts to tile multiples.
    n_pad = _round_up(max(n, _LANE), _LANE)
    if n_pad > _MAX_TILE:
        n_pad = _round_up(n_pad, _MAX_TILE)
    tile = min(n_pad, _MAX_TILE)
    f_pad = _round_up(f_in, _LANE)
    h_pad = _round_up(hidden, _LANE)
    o_pad = _round_up(out_dim, _LANE)
    g_pad = _round_up(num_graphs, _SUBLANE)

    # --- glue: densify graph structure (plain JAX) ---
    src, dst = edge_index[0], edge_index[1]
    # (A + I)[target, source]: (adj @ x)[i] = x_i + sum of incoming messages,
    # i.e. the GIN aggregation with eps = 0.  bf16 is exact for these integers.
    adj = (jnp.zeros((n_pad, n_pad), jnp.float32).at[dst, src].add(1.0)
           + jnp.eye(n_pad, dtype=jnp.float32)).astype(jnp.bfloat16)

    # Pooling matrix [G_pad, N_pad]; padded nodes map to no graph (row of zeros).
    batch_pad = jnp.full((n_pad,), -1, jnp.int32).at[:n].set(batch)
    pool = jax.nn.one_hot(batch_pad, g_pad, dtype=jnp.bfloat16).T

    # Zero-pad inputs and weights (padding is exact zeros -> results unchanged).
    xp = _pad2d(x, n_pad, f_pad)
    w1a = _pad2d(params["w1a"], f_pad, h_pad); b1a = _pad2d(params["b1a"], 1, h_pad)
    w1b = _pad2d(params["w1b"], h_pad, h_pad); b1b = _pad2d(params["b1b"], 1, h_pad)
    w2a = _pad2d(params["w2a"], h_pad, h_pad); b2a = _pad2d(params["b2a"], 1, h_pad)
    w2b = _pad2d(params["w2b"], h_pad, h_pad); b2b = _pad2d(params["b2b"], 1, h_pad)
    wf = _pad2d(params["wf"], h_pad, o_pad);   bf = _pad2d(params["bf"], 1, o_pad)

    # --- hot path: Pallas kernels ---
    h = gin_conv(adj, xp, w1a, b1a, w1b, b1b, tm=tile, tk=tile)
    h = gin_conv(adj, h, w2a, b2a, w2b, b2b, tm=tile, tk=tile)
    out = pool_fc(pool, h, wf, bf, tk=tile)
    return out[:num_graphs, :out_dim]


# ----------------------------------------------------------------------------
# Deterministic parameter init (PyTorch nn.Linear-style uniform)
# ----------------------------------------------------------------------------
def linear_init(key, fan_in, fan_out):
    kw, kb = jax.random.split(key)
    bound = 1.0 / jnp.sqrt(fan_in)
    w = jax.random.uniform(kw, (fan_in, fan_out), jnp.float32, -bound, bound)
    b = jax.random.uniform(kb, (1, fan_out), jnp.float32, -bound, bound)
    return w, b


def make_params(key, input_dim, hidden_dim, output_dim):
    keys = jax.random.split(key, 5)
    w1a, b1a = linear_init(keys[0], input_dim, hidden_dim)
    w1b, b1b = linear_init(keys[1], hidden_dim, hidden_dim)
    w2a, b2a = linear_init(keys[2], hidden_dim, hidden_dim)
    w2b, b2b = linear_init(keys[3], hidden_dim, hidden_dim)
    wf, bf = linear_init(keys[4], hidden_dim, output_dim)
    return dict(
        w1a=w1a, b1a=b1a, w1b=w1b, b1b=b1b,
        w2a=w2a, b2a=b2a, w2b=w2b, b2b=b2b,
        wf=wf, bf=bf,
    )


# Pure-JAX f32 reference for correctness checks.
def gin_reference(params, x, edge_index, batch, num_graphs):
    n = x.shape[0]
    src, dst = edge_index[0], edge_index[1]
    adj = jnp.zeros((n, n), jnp.float32).at[dst, src].add(1.0)

    def conv(xx, wa, ba, wb, bb):
        agg = adj @ xx + xx
        h = jnp.maximum(agg @ wa + ba, 0.0)
        return jnp.maximum(h @ wb + bb, 0.0)

    h = conv(x, params["w1a"], params["b1a"], params["w1b"], params["b1b"])
    h = conv(h, params["w2a"], params["b2a"], params["w2b"], params["b2b"])
    pooled = jnp.zeros((num_graphs, h.shape[1]), jnp.float32).at[batch].add(h)
    return pooled @ params["wf"] + params["bf"]


if __name__ == "__main__":
    input_dim, hidden_dim, output_dim = 8, 32, 4
    key = jax.random.PRNGKey(0)
    k_params, k_x = jax.random.split(key)
    params = make_params(k_params, input_dim, hidden_dim, output_dim)

    def make_graph_batch(nodes_per_graph, num_graphs, kx):
        # Directed ring edges within each graph (both directions).
        n = nodes_per_graph * num_graphs
        x = jax.random.normal(kx, (n, input_dim), jnp.float32)
        srcs, dsts = [], []
        for g in range(num_graphs):
            base = g * nodes_per_graph
            for i in range(nodes_per_graph):
                a = base + i
                b = base + (i + 1) % nodes_per_graph
                srcs += [a, b]
                dsts += [b, a]
        edge_index = jnp.array([srcs, dsts], dtype=jnp.int32)
        batch = jnp.repeat(jnp.arange(num_graphs, dtype=jnp.int32), nodes_per_graph)
        return x, edge_index, batch

    num_graphs = 2
    # First config: tiny (single tile, grid 1x1).  Second: exercises the
    # multi-tile accumulation path (N padded to 1024, 512-tiles, grid 2x2,
    # x VMEM-resident).
    for nodes_per_graph in (8, 320):
        x, edge_index, batch = make_graph_batch(nodes_per_graph, num_graphs, k_x)
        out = gin_forward(params, x, edge_index, batch, num_graphs)
        out = jax.block_until_ready(out)

        ref = gin_reference(params, x, edge_index, batch, num_graphs)
        assert out.shape == (num_graphs, output_dim)
        assert jnp.allclose(out, ref, atol=1e-3, rtol=1e-3), (
            f"mismatch vs reference (nodes_per_graph={nodes_per_graph})")

    print("KERNEL_OK")
</pallas_src>

<mosaic_0001>
module attributes {stable_mosaic.version = 11 : i64} {
  func.func private @main(%arg0: i32) attributes {dimension_semantics = [#tpu.dimension_semantics<core_parallel>], iteration_bounds = array<i64: 2>, tpu.core_type = #tpu.core_type<sc_scalar_subcore>, window_params = []} {
    return
  }
}

module attributes {stable_mosaic.version = 11 : i64} {
  func.func private @main(%arg0: i32) attributes {dimension_semantics = [#tpu.dimension_semantics<core_parallel>], iteration_bounds = array<i64: 2>, tpu.core_type = #tpu.core_type<sc_scalar_subcore>, window_params = []} {
    return
  }
}

module attributes {stable_mosaic.version = 11 : i64} {
  func.func @pool_fc_kernel(%arg0: i32, %arg1: memref<8x128xbf16, #tpu.memory_space<vmem>>, %arg2: memref<128x128xf32, #tpu.memory_space<vmem>>, %arg3: memref<128x128xf32, #tpu.memory_space<vmem>>, %arg4: memref<1x128xf32, #tpu.memory_space<vmem>>, %arg5: memref<8x128xf32, #tpu.memory_space<vmem>>, %arg6: memref<8x128xf32, #tpu.memory_space<vmem>>) attributes {dimension_semantics = [#tpu.dimension_semantics<arbitrary>], iteration_bounds = array<i64: 1>, scalar_prefetch = 0 : i64, scratch_operands = 1 : i64, tpu.core_type = #tpu.core_type<tc>, window_params = [{transform_indices = @transform_0, window_bounds = array<i64: 8, 128>}, {transform_indices = @transform_1, window_bounds = array<i64: 128, 128>}, {pipeline_mode = #tpu.pipeline_mode<synchronous>, transform_indices = @transform_2, window_bounds = array<i64: 128, 128>}, {pipeline_mode = #tpu.pipeline_mode<synchronous>, transform_indices = @transform_3, window_bounds = array<i64: 1, 128>}, {pipeline_mode = #tpu.pipeline_mode<synchronous>, transform_indices = @transform_4, window_bounds = array<i64: 8, 128>}]} {
    %c0_i32 = arith.constant 0 : i32
    %0 = arith.cmpi eq, %arg0, %c0_i32 : i32
    %1 = arith.extui %0 : i1 to i32
    %c0_i32_0 = arith.constant 0 : i32
    %2 = arith.cmpi ne, %1, %c0_i32_0 : i32
    scf.if %2 {
      %cst_10 = arith.constant 0.000000e+00 : f32
      %13 = vector.broadcast %cst_10 : f32 to vector<8x128xf32>
      %c0_11 = arith.constant 0 : index
      %c0_12 = arith.constant 0 : index
      %14 = vector.load %arg6[%c0_11, %c0_12] : memref<8x128xf32, #tpu.memory_space<vmem>>, vector<8x128xf32>
      tpu.vector_store %arg6[%c0_11, %c0_12], %13 {strides = array<i32>} : memref<8x128xf32, #tpu.memory_space<vmem>>, vector<8x128xf32>,
    } else {
    }
    %c0 = arith.constant 0 : index
    %c0_1 = arith.constant 0 : index
    %3 = vector.load %arg6[%c0, %c0_1] : memref<8x128xf32, #tpu.memory_space<vmem>>, vector<8x128xf32>
    %c0_2 = arith.constant 0 : index
    %c0_3 = arith.constant 0 : index
    %4 = vector.load %arg1[%c0_2, %c0_3] : memref<8x128xbf16, #tpu.memory_space<vmem>>, vector<8x128xbf16>
    %5 = arith.extf %4 : vector<8x128xbf16> to vector<8x128xf32>
    %c0_4 = arith.constant 0 : index
    %c0_5 = arith.constant 0 : index
    %6 = vector.load %arg2[%c0_4, %c0_5] : memref<128x128xf32, #tpu.memory_space<vmem>>, vector<128x128xf32>
    %cst = arith.constant dense<0.000000e+00> : vector<8x128xf32>
    %7 = tpu.matmul %5, %6, %cst {dimension_numbers = #tpu.dot_dimension_numbers<[1], [0], [0], [1], [0, 0, 1, 1], [], []>} : vector<8x128xf32>, vector<128x128xf32>, vector<8x128xf32> -> vector<8x128xf32>
    %8 = arith.addf %3, %7 : vector<8x128xf32>
    %c0_6 = arith.constant 0 : index
    %c0_7 = arith.constant 0 : index
    %9 = vector.load %arg6[%c0_6, %c0_7] : memref<8x128xf32, #tpu.memory_space<vmem>>, vector<8x128xf32>
    tpu.vector_store %arg6[%c0_6, %c0_7], %8 {strides = array<i32>} : memref<8x128xf32, #tpu.memory_space<vmem>>, vector<8x128xf32>,
    %c0_i32_8 = arith.constant 0 : i32
    %10 = arith.cmpi eq, %arg0, %c0_i32_8 : i32
    %11 = arith.extui %10 : i1 to i32
    %c0_i32_9 = arith.constant 0 : i32
    %12 = arith.cmpi ne, %11, %c0_i32_9 : i32
    scf.if %12 {
      %c0_10 = arith.constant 0 : index
      %c0_11 = arith.constant 0 : index
      %13 = vector.load %arg6[%c0_10, %c0_11] : memref<8x128xf32, #tpu.memory_space<vmem>>, vector<8x128xf32>
      %c0_12 = arith.constant 0 : index
      %c0_13 = arith.constant 0 : index
      %14 = vector.load %arg3[%c0_12, %c0_13] : memref<128x128xf32, #tpu.memory_space<vmem>>, vector<128x128xf32>
      %cst_14 = arith.constant dense<0.000000e+00> : vector<8x128xf32>
      %15 = tpu.matmul %13, %14, %cst_14 {dimension_numbers = #tpu.dot_dimension_numbers<[1], [0], [0], [1], [0, 0, 1, 1], [], []>} : vector<8x128xf32>, vector<128x128xf32>, vector<8x128xf32> -> vector<8x128xf32>
      %c0_15 = arith.constant 0 : index
      %c0_16 = arith.constant 0 : index
      %16 = vector.load %arg4[%c0_15, %c0_16] : memref<1x128xf32, #tpu.memory_space<vmem>>, vector<1x128xf32>
      %17 = vector.broadcast %16 : vector<1x128xf32> to vector<8x128xf32>
      %18 = arith.addf %15, %17 : vector<8x128xf32>
      %c0_17 = arith.constant 0 : index
      %c0_18 = arith.constant 0 : index
      %19 = vector.load %arg5[%c0_17, %c0_18] : memref<8x128xf32, #tpu.memory_space<vmem>>, vector<8x128xf32>
      tpu.vector_store %arg5[%c0_17, %c0_18], %18 {strides = array<i32>} : memref<8x128xf32, #tpu.memory_space<vmem>>, vector<8x128xf32>,
    } else {
    }
    return
  }
  func.func @transform_0(%arg0: i32) -> (i32, i32) {
    %c0_i32 = arith.constant 0 : i32
    %c0_i32_0 = arith.constant 0 : i32
    return %c0_i32, %arg0 : i32, i32
  }
  func.func @transform_1(%arg0: i32) -> (i32, i32) {
    %c0_i32 = arith.constant 0 : i32
    %c0_i32_0 = arith.constant 0 : i32
    return %arg0, %c0_i32 : i32, i32
  }
  func.func @transform_2(%arg0: i32) -> (i32, i32) {
    %c0_i32 = arith.constant 0 : i32
    %c0_i32_0 = arith.constant 0 : i32
    %c0_i32_1 = arith.constant 0 : i32
    return %c0_i32, %c0_i32_0 : i32, i32
  }
  func.func @transform_3(%arg0: i32) -> (i32, i32) {
    %c0_i32 = arith.constant 0 : i32
    %c0_i32_0 = arith.constant 0 : i32
    %c0_i32_1 = arith.constant 0 : i32
    return %c0_i32, %c0_i32_0 : i32, i32
  }
  func.func @transform_4(%arg0: i32) -> (i32, i32) {
    %c0_i32 = arith.constant 0 : i32
    %c0_i32_0 = arith.constant 0 : i32
    %c0_i32_1 = arith.constant 0 : i32
    return %c0_i32, %c0_i32_0 : i32, i32
  }
}

module attributes {stable_mosaic.version = 11 : i64} {
  func.func @gin_conv_kernel(%arg0: i32, %arg1: i32, %arg2: memref<128x128xbf16, #tpu.memory_space<vmem>>, %arg3: memref<128x128xf32, #tpu.memory_space<vmem>>, %arg4: memref<128x128xf32, #tpu.memory_space<vmem>>, %arg5: memref<1x128xf32, #tpu.memory_space<vmem>>, %arg6: memref<128x128xf32, #tpu.memory_space<vmem>>, %arg7: memref<1x128xf32, #tpu.memory_space<vmem>>, %arg8: memref<128x128xf32, #tpu.memory_space<vmem>>, %arg9: memref<128x128xf32, #tpu.memory_space<vmem>>) attributes {dimension_semantics = [#tpu.dimension_semantics<parallel>, #tpu.dimension_semantics<arbitrary>], iteration_bounds = array<i64: 1, 1>, scalar_prefetch = 0 : i64, scratch_operands = 1 : i64, tpu.core_type = #tpu.core_type<tc>, window_params = [{transform_indices = @transform_0, window_bounds = array<i64: 128, 128>}, {pipeline_mode = #tpu.pipeline_mode<synchronous>, transform_indices = @transform_1, window_bounds = array<i64: 128, 128>}, {pipeline_mode = #tpu.pipeline_mode<synchronous>, transform_indices = @transform_2, window_bounds = array<i64: 128, 128>}, {pipeline_mode = #tpu.pipeline_mode<synchronous>, transform_indices = @transform_3, window_bounds = array<i64: 1, 128>}, {pipeline_mode = #tpu.pipeline_mode<synchronous>, transform_indices = @transform_4, window_bounds = array<i64: 128, 128>}, {pipeline_mode = #tpu.pipeline_mode<synchronous>, transform_indices = @transform_5, window_bounds = array<i64: 1, 128>}, {transform_indices = @transform_6, window_bounds = array<i64: 128, 128>}]} {
    %c0_i32 = arith.constant 0 : i32
    %0 = arith.cmpi eq, %arg1, %c0_i32 : i32
    %1 = arith.extui %0 : i1 to i32
    %c0_i32_0 = arith.constant 0 : i32
    %2 = arith.cmpi ne, %1, %c0_i32_0 : i32
    scf.if %2 {
      %cst_9 = arith.constant 0.000000e+00 : f32
      %16 = vector.broadcast %cst_9 : f32 to vector<128x128xf32>
      %c0_10 = arith.constant 0 : index
      %c0_11 = arith.constant 0 : index
      %17 = vector.load %arg9[%c0_10, %c0_11] : memref<128x128xf32, #tpu.memory_space<vmem>>, vector<128x128xf32>
      tpu.vector_store %arg9[%c0_10, %c0_11], %16 {strides = array<i32>} : memref<128x128xf32, #tpu.memory_space<vmem>>, vector<128x128xf32>,
    } else {
    }
    %c128_i32 = arith.constant 128 : i32
    %3 = arith.muli %arg1, %c128_i32 : i32
    %4 = tpu.assume_multiple %3, 128 : i32
    %5 = arith.index_cast %4 : i32 to index
    %c0 = arith.constant 0 : index
    %6 = vector.load %arg3[%5, %c0] : memref<128x128xf32, #tpu.memory_space<vmem>>, vector<128x128xf32>
    %c0_1 = arith.constant 0 : index
    %c0_2 = arith.constant 0 : index
    %7 = vector.load %arg9[%c0_1, %c0_2] : memref<128x128xf32, #tpu.memory_space<vmem>>, vector<128x128xf32>
    %c0_3 = arith.constant 0 : index
    %c0_4 = arith.constant 0 : index
    %8 = vector.load %arg2[%c0_3, %c0_4] : memref<128x128xbf16, #tpu.memory_space<vmem>>, vector<128x128xbf16>
    %9 = arith.extf %8 : vector<128x128xbf16> to vector<128x128xf32>
    %cst = arith.constant dense<0.000000e+00> : vector<128x128xf32>
    %10 = tpu.matmul %9, %6, %cst {dimension_numbers = #tpu.dot_dimension_numbers<[1], [0], [0], [1], [0, 0, 1, 1], [], []>} : vector<128x128xf32>, vector<128x128xf32>, vector<128x128xf32> -> vector<128x128xf32>
    %11 = arith.addf %7, %10 : vector<128x128xf32>
    %c0_5 = arith.constant 0 : index
    %c0_6 = arith.constant 0 : index
    %12 = vector.load %arg9[%c0_5, %c0_6] : memref<128x128xf32, #tpu.memory_space<vmem>>, vector<128x128xf32>
    tpu.vector_store %arg9[%c0_5, %c0_6], %11 {strides = array<i32>} : memref<128x128xf32, #tpu.memory_space<vmem>>, vector<128x128xf32>,
    %c0_i32_7 = arith.constant 0 : i32
    %13 = arith.cmpi eq, %arg1, %c0_i32_7 : i32
    %14 = arith.extui %13 : i1 to i32
    %c0_i32_8 = arith.constant 0 : i32
    %15 = arith.cmpi ne, %14, %c0_i32_8 : i32
    scf.if %15 {
      %c0_9 = arith.constant 0 : index
      %c0_10 = arith.constant 0 : index
      %16 = vector.load %arg9[%c0_9, %c0_10] : memref<128x128xf32, #tpu.memory_space<vmem>>, vector<128x128xf32>
      %c0_11 = arith.constant 0 : index
      %c0_12 = arith.constant 0 : index
      %17 = vector.load %arg4[%c0_11, %c0_12] : memref<128x128xf32, #tpu.memory_space<vmem>>, vector<128x128xf32>
      %cst_13 = arith.constant dense<0.000000e+00> : vector<128x128xf32>
      %18 = tpu.matmul %16, %17, %cst_13 {dimension_numbers = #tpu.dot_dimension_numbers<[1], [0], [0], [1], [0, 0, 1, 1], [], []>} : vector<128x128xf32>, vector<128x128xf32>, vector<128x128xf32> -> vector<128x128xf32>
      %c0_14 = arith.constant 0 : index
      %c0_15 = arith.constant 0 : index
      %19 = vector.load %arg5[%c0_14, %c0_15] : memref<1x128xf32, #tpu.memory_space<vmem>>, vector<1x128xf32>
      %20 = vector.broadcast %19 : vector<1x128xf32> to vector<128x128xf32>
      %21 = arith.addf %18, %20 : vector<128x128xf32>
      %cst_16 = arith.constant 0.000000e+00 : f32
      %22 = vector.broadcast %cst_16 : f32 to vector<128x128xf32>
      %23 = arith.maximumf %21, %22 : vector<128x128xf32>
      %c0_17 = arith.constant 0 : index
      %c0_18 = arith.constant 0 : index
      %24 = vector.load %arg6[%c0_17, %c0_18] : memref<128x128xf32, #tpu.memory_space<vmem>>, vector<128x128xf32>
      %cst_19 = arith.constant dense<0.000000e+00> : vector<128x128xf32>
      %25 = tpu.matmul %23, %24, %cst_19 {dimension_numbers = #tpu.dot_dimension_numbers<[1], [0], [0], [1], [0, 0, 1, 1], [], []>} : vector<128x128xf32>, vector<128x128xf32>, vector<128x128xf32> -> vector<128x128xf32>
      %c0_20 = arith.constant 0 : index
      %c0_21 = arith.constant 0 : index
      %26 = vector.load %arg7[%c0_20, %c0_21] : memref<1x128xf32, #tpu.memory_space<vmem>>, vector<1x128xf32>
      %27 = vector.broadcast %26 : vector<1x128xf32> to vector<128x128xf32>
      %28 = arith.addf %25, %27 : vector<128x128xf32>
      %cst_22 = arith.constant 0.000000e+00 : f32
      %29 = vector.broadcast %cst_22 : f32 to vector<128x128xf32>
      %30 = arith.maximumf %28, %29 : vector<128x128xf32>
      %c0_23 = arith.constant 0 : index
      %c0_24 = arith.constant 0 : index
      %31 = vector.load %arg8[%c0_23, %c0_24] : memref<128x128xf32, #tpu.memory_space<vmem>>, vector<128x128xf32>
      tpu.vector_store %arg8[%c0_23, %c0_24], %30 {strides = array<i32>} : memref<128x128xf32, #tpu.memory_space<vmem>>, vector<128x128xf32>,
    } else {
    }
    return
  }
  func.func @transform_0(%arg0: i32, %arg1: i32) -> (i32, i32) {
    %c0_i32 = arith.constant 0 : i32
    return %arg0, %arg1 : i32, i32
  }
  func.func @transform_1(%arg0: i32, %arg1: i32) -> (i32, i32) {
    %c0_i32 = arith.constant 0 : i32
    %c0_i32_0 = arith.constant 0 : i32
    %c0_i32_1 = arith.constant 0 : i32
    return %c0_i32, %c0_i32_0 : i32, i32
  }
  func.func @transform_2(%arg0: i32, %arg1: i32) -> (i32, i32) {
    %c0_i32 = arith.constant 0 : i32
    %c0_i32_0 = arith.constant 0 : i32
    %c0_i32_1 = arith.constant 0 : i32
    return %c0_i32, %c0_i32_0 : i32, i32
  }
  func.func @transform_3(%arg0: i32, %arg1: i32) -> (i32, i32) {
    %c0_i32 = arith.constant 0 : i32
    %c0_i32_0 = arith.constant 0 : i32
    %c0_i32_1 = arith.constant 0 : i32
    return %c0_i32, %c0_i32_0 : i32, i32
  }
  func.func @transform_4(%arg0: i32, %arg1: i32) -> (i32, i32) {
    %c0_i32 = arith.constant 0 : i32
    %c0_i32_0 = arith.constant 0 : i32
    %c0_i32_1 = arith.constant 0 : i32
    return %c0_i32, %c0_i32_0 : i32, i32
  }
  func.func @transform_5(%arg0: i32, %arg1: i32) -> (i32, i32) {
    %c0_i32 = arith.constant 0 : i32
    %c0_i32_0 = arith.constant 0 : i32
    %c0_i32_1 = arith.constant 0 : i32
    return %c0_i32, %c0_i32_0 : i32, i32
  }
  func.func @transform_6(%arg0: i32, %arg1: i32) -> (i32, i32) {
    %c0_i32 = arith.constant 0 : i32
    %c0_i32_0 = arith.constant 0 : i32
    return %arg0, %c0_i32 : i32, i32
  }
}

</mosaic_0001>

<bundles_post_ra>
// kernel: gin_forward.5
= control target key start
LH: loop header
LB: loop body
LE: loop exit
PB: predicated region body
PF: predicated region fallthrough
CT: control target
= control target key end

     0   :  { %v371_v0 = vmov 0.0|0.0   ;;  %vm372_vm0 = vmmov 0   ;;  %v373_v4 = vmov 0.0   ;;  %s520_s1 = inlined_call_operand.vmem [shape: f32[128,128], index: 1, kind: input, shape index: {}]   ;;  %s521_s2 = inlined_call_operand.vmem [shape: f32[128,128], index: 2, kind: input, shape index: {}]   ;;  %s522_s0 = inlined_call_operand.vmem [shape: bf16[8,128], index: 0, kind: input, shape index: {}]   ;;  %s523_s3 = inlined_call_operand.vmem [shape: f32[1,128], index: 3, kind: input, shape index: {}]   ;;  %s524_s4 = inlined_call_operand.vmem [shape: f32[8,128], index: 4, kind: output, shape index: {}]  }
   0x1   :  { %320 = vmatprep.subr.bf16.mxu0 %v371_v0  ;;  %v25_v1 = vld [vmem:[%s520_s1] sm:$0xff]  ;;  %v26_v2 = vld [vmem:[%s520_s1 + $0x8] sm:$0xff]  ;;  %v27_v3 = vld [vmem:[%s520_s1 + $0x10] sm:$0xff]  ;;  %282 = vmatprep.mubr.msk.f32.mxu0 %vm372_vm0, %v373_v4 }
   0x2   :  { %v321_v5 = vpack.c.bf16 %v26_v2, %v25_v1  ;;  %v28_v6 = vld [vmem:[%s520_s1 + $0x18] sm:$0xff]  ;;  %344 = vmatprep.subr.bf16.mxu1 %v371_v0  ;;  %317 = vmatprep.mubr.msk.f32.mxu1 %vm372_vm0, %v373_v4  ;;  %v29_v8 = vld [vmem:[%s520_s1 + $0x20] sm:$0xff]  ;;  %v30_v9 = vld [vmem:[%s520_s1 + $0x28] sm:$0xff] }
   0x3   :  { %v324_v7 = vpack.c.bf16 %v28_v6, %v27_v3  ;;  %v117_v10 = vld [vmem:[%s521_s2] sm:$0xff]  ;;  %v118_v11 = vld [vmem:[%s521_s2 + $0x8] sm:$0xff]  ;;  %v119_v12 = vld [vmem:[%s521_s2 + $0x10] sm:$0xff]  ;;  %v327_v14 = vpack.c.bf16 %v30_v9, %v29_v8 }
   0x4   :  { %322 = vmatpush3.bf16.msra.mxu0 %v321_v5  ;;  %v120_v13 = vld [vmem:[%s521_s2 + $0x18] sm:$0xff]  ;;  %v345_v15 = vpack.c.bf16 %v118_v11, %v117_v10  ;;  %v31_v16 = vld [vmem:[%s520_s1 + $0x30] sm:$0xff]  ;;  %v121_v19 = vld [vmem:[%s521_s2 + $0x20] sm:$0xff] }
   0x5   :  { %323 = vmatprep.subr.bf16.mxu0 %v371_v0  ;;  %v32_v17 = vld [vmem:[%s520_s1 + $0x38] sm:$0xff]  ;;  %v348_v18 = vpack.c.bf16 %v120_v13, %v119_v12  ;;  %v122_v20 = vld [vmem:[%s521_s2 + $0x28] sm:$0xff]  ;;  %v33_v22 = vld [vmem:[%s520_s1 + $0x40] sm:$0xff] }
   0x6   :  { %346 = vmatpush3.bf16.msra.mxu1 %v345_v15  ;;  %v330_v21 = vpack.c.bf16 %v32_v17, %v31_v16  ;;  %v34_v23 = vld [vmem:[%s520_s1 + $0x48] sm:$0xff]  ;;  %v351_v24 = vpack.c.bf16 %v122_v20, %v121_v19  ;;  %v123_v25 = vld [vmem:[%s521_s2 + $0x30] sm:$0xff]  ;;  %v124_v26 = vld [vmem:[%s521_s2 + $0x38] sm:$0xff] }
   0x7   :  { %347 = vmatprep.subr.bf16.mxu1 %v371_v0  ;;  %v333_v27 = vpack.c.bf16 %v34_v23, %v33_v22  ;;  %v35_v28 = vld [vmem:[%s520_s1 + $0x50] sm:$0xff]  ;;  %v36_v29 = vld [vmem:[%s520_s1 + $0x58] sm:$0xff]  ;;  %v354_v30 = vpack.c.bf16 %v124_v26, %v123_v25  ;;  %v125_v31 = vld [vmem:[%s521_s2 + $0x40] sm:$0xff] }
   0x8   :  { %325 = vmatpush3.bf16.msra.mxu0 %v324_v7  ;;  %v126_v32 = vld [vmem:[%s521_s2 + $0x48] sm:$0xff]  ;;  %v336_v33 = vpack.c.bf16 %v36_v29, %v35_v28  ;;  %v37_v34 = vld [vmem:[%s520_s1 + $0x60] sm:$0xff]  ;;  %v127_v37 = vld [vmem:[%s521_s2 + $0x50] sm:$0xff] }
   0x9   :  { %326 = vmatprep.subr.bf16.mxu0 %v371_v0  ;;  %v38_v35 = vld [vmem:[%s520_s1 + $0x68] sm:$0xff]  ;;  %v357_v36 = vpack.c.bf16 %v126_v32, %v125_v31  ;;  %v128_v38 = vld [vmem:[%s521_s2 + $0x58] sm:$0xff]  ;;  %v39_v40 = vld [vmem:[%s520_s1 + $0x70] sm:$0xff] }
   0xa   :  { %349 = vmatpush3.bf16.msra.mxu1 %v348_v18  ;;  %v339_v39 = vpack.c.bf16 %v38_v35, %v37_v34  ;;  %v40_v41 = vld [vmem:[%s520_s1 + $0x78] sm:$0xff]  ;;  %v360_v42 = vpack.c.bf16 %v128_v38, %v127_v37  ;;  %v129_v43 = vld [vmem:[%s521_s2 + $0x60] sm:$0xff]  ;;  %v130_v44 = vld [vmem:[%s521_s2 + $0x68] sm:$0xff] }
   0xb   :  { %350 = vmatprep.subr.bf16.mxu1 %v371_v0  ;;  %v342_v45 = vpack.c.bf16 %v40_v41, %v39_v40  ;;  %v23_v46 = vld [vmem:[%s522_s0] sm:$0xf]  ;;  %v363_v47 = vpack.c.bf16 %v130_v44, %v129_v43  ;;  %v131_v49 = vld [vmem:[%s521_s2 + $0x70] sm:$0xff]  ;;  %v132_v50 = vld [vmem:[%s521_s2 + $0x78] sm:$0xff] }
   0xc   :  { %328 = vmatpush3.bf16.msra.mxu0 %v327_v14  ;;  %v24_v48 = vunpack.c.l.bf16 %v23_v46  ;;  %v366_v51 = vpack.c.bf16 %v132_v50, %v131_v49  ;;  %v215_v54 = vld [vmem:[%s523_s3] ss:$0 sm:$0xff] }
   0xd   :  { %329 = vmatprep.subr.bf16.mxu0 %v371_v0 }
   0xe   :  { %352 = vmatpush3.bf16.msra.mxu1 %v351_v24 }
   0xf   :  { %353 = vmatprep.subr.bf16.mxu1 %v371_v0 }
  0x10   :  { %331 = vmatpush3.bf16.msra.mxu0 %v330_v21 }
  0x11   :  { %332 = vmatprep.subr.bf16.mxu0 %v371_v0 }
  0x12   :  { %355 = vmatpush3.bf16.msra.mxu1 %v354_v30 }
  0x13   :  { %356 = vmatprep.subr.bf16.mxu1 %v371_v0 }
  0x14   :  { %334 = vmatpush3.bf16.msra.mxu0 %v333_v27 }
  0x15   :  { %335 = vmatprep.subr.bf16.mxu0 %v371_v0 }
  0x16   :  { %358 = vmatpush3.bf16.msra.mxu1 %v357_v36 }
  0x17   :  { %359 = vmatprep.subr.bf16.mxu1 %v371_v0 }
  0x18   :  { %337 = vmatpush3.bf16.msra.mxu0 %v336_v33 }
  0x19   :  { %338 = vmatprep.subr.bf16.mxu0 %v371_v0 }
  0x1a   :  { %361 = vmatpush3.bf16.msra.mxu1 %v360_v42 }
  0x1b   :  { %362 = vmatprep.subr.bf16.mxu1 %v371_v0 }
  0x1c   :  { %340 = vmatpush3.bf16.msra.mxu0 %v339_v39 }
  0x1d   :  { %341 = vmatprep.subr.bf16.mxu0 %v371_v0 }
  0x1e   :  { %364 = vmatpush3.bf16.msra.mxu1 %v363_v47 }
  0x1f   :  { %365 = vmatprep.subr.bf16.mxu1 %v371_v0 }
  0x20   :  { %343 = vmatpush3.bf16.msra.mxu0 %v342_v45 }
  0x22   :  { %367 = vmatpush3.bf16.msra.mxu1 %v366_v51 }
  0x23   :  { %283 = vmatmul.mubr.f32.vlgmr.msra.gmra.mrb[0].mxu0 %v24_v48 }
  0xf6   :  { %v107_v52 = vpop.f32.mrb[0].mxu0 }
  0xf7   :  { %v284_v53 = vpop.f32.mrb[1].mxu0  ;;  %318 = vmatmul.mubr.f32.vlgmr.msra.gmra.mrb[0].mxu1 %v107_v52 }
 0x1ca   :  { %v206_v55 = vpop.f32.mrb[0].mxu1 }
 0x1cb   :  { %v207_v56 = vadd.f32 %v215_v54, %v206_v55  ;;  %v319_v57 = vpop.f32.mrb[1].mxu1 }
 0x1cd   :  { %210 = vst [vmem:[%s524_s4] sm:$0xff] %v207_v56 }

// kernel: gin_forward.3
= control target key start
LH: loop header
LB: loop body
LE: loop exit
PB: predicated region body
PF: predicated region fallthrough
CT: control target
= control target key end

     0   :  { %s1371_s1 = inlined_call_operand.vmem [shape: f32[128,128], index: 1, kind: input, shape index: {}]   ;;  %s1372_s0 = inlined_call_operand.vmem [shape: bf16[128,128], index: 0, kind: input, shape index: {}]   ;;  %s1373_s2 = inlined_call_operand.vmem [shape: f32[128,128], index: 2, kind: input, shape index: {}]   ;;  %s1374_s4 = inlined_call_operand.vmem [shape: f32[128,128], index: 4, kind: input, shape index: {}]   ;;  %s1375_s3 = inlined_call_operand.vmem [shape: f32[1,128], index: 3, kind: input, shape index: {}]   ;;  %s1376_s5 = inlined_call_operand.vmem [shape: f32[1,128], index: 5, kind: input, shape index: {}]   ;;  %s1377_s6 = inlined_call_operand.vmem [shape: f32[128,128], index: 6, kind: output, shape index: {}]  }
   0x1   :  { %v45_v0 = vld [vmem:[%s1371_s1] sm:$0xff]  ;;  %v46_v1 = vld [vmem:[%s1371_s1 + $0x8] sm:$0xff]  ;;  %v47_v2 = vld [vmem:[%s1371_s1 + $0x10] sm:$0xff] }
   0x2   :  { %v998_v3 = vpack.c.bf16 %v46_v1, %v45_v0  ;;  %v48_v4 = vld [vmem:[%s1371_s1 + $0x18] sm:$0xff]  ;;  %v49_v6 = vld [vmem:[%s1371_s1 + $0x20] sm:$0xff]  ;;  %v50_v7 = vld [vmem:[%s1371_s1 + $0x28] sm:$0xff] }
   0x3   :  { %v1002_v5 = vpack.c.bf16 %v48_v4, %v47_v2  ;;  %v1006_v8 = vpack.c.bf16 %v50_v7, %v49_v6  ;;  %v1166_v9 = vld [vmem:[%s1372_s0] sm:$0xff]   ;;  %v51_v10 = vld [vmem:[%s1371_s1 + $0x30] sm:$0xff]  ;;  %v52_v11 = vld [vmem:[%s1371_s1 + $0x38] sm:$0xff] }
   0x4   :  { %999 = vmatprep.subr.bf16.mxu0 %v998_v3  ;;  %v697_v12 = vunpack.c.l.bf16 %v1166_v9  ;;  %v305_v13 = vld [vmem:[%s1373_s2] sm:$0xff]  ;;  %v306_v14 = vld [vmem:[%s1373_s2 + $0x8] sm:$0xff]  ;;  %v307_v15 = vld [vmem:[%s1373_s2 + $0x10] sm:$0xff]  ;;  %v1010_v16 = vpack.c.bf16 %v52_v11, %v51_v10  ;;  %v698_v48 = vunpack.c.h.bf16 %v1166_v9 }
   0x5   :  { %1001 = vmatpush3.bf16.msra.mxu0 %v998_v3  ;;  %v308_v17 = vld [vmem:[%s1373_s2 + $0x18] sm:$0xff]  ;;  %v53_v18 = vld [vmem:[%s1371_s1 + $0x40] sm:$0xff]  ;;  %v54_v19 = vld [vmem:[%s1371_s1 + $0x48] sm:$0xff]  ;;  %v1030_v20 = vpack.c.bf16 %v306_v14, %v305_v13 }
   0x6   :  { %1003 = vmatprep.subr.bf16.mxu0 %v1002_v5  ;;  %862 = vmatprep.mubr.f32.mxu0 %v697_v12  ;;  %v1034_v21 = vpack.c.bf16 %v308_v17, %v307_v15  ;;  %v309_v22 = vld [vmem:[%s1373_s2 + $0x20] sm:$0xff]  ;;  %v310_v23 = vld [vmem:[%s1373_s2 + $0x28] sm:$0xff]  ;;  %v1014_v24 = vpack.c.bf16 %v54_v19, %v53_v18  ;;  %v55_v25 = vld [vmem:[%s1371_s1 + $0x50] sm:$0xff] }
   0x7   :  { %1031 = vmatprep.subr.bf16.mxu1 %v1030_v20  ;;  %v56_v26 = vld [vmem:[%s1371_s1 + $0x58] sm:$0xff]  ;;  %v1038_v27 = vpack.c.bf16 %v310_v23, %v309_v22  ;;  %v311_v28 = vld [vmem:[%s1373_s2 + $0x30] sm:$0xff]  ;;  %v57_v31 = vld [vmem:[%s1371_s1 + $0x60] sm:$0xff] }
   0x8   :  { %1033 = vmatpush3.bf16.msra.mxu1 %v1030_v20  ;;  %v312_v29 = vld [vmem:[%s1373_s2 + $0x38] sm:$0xff]  ;;  %v1018_v30 = vpack.c.bf16 %v56_v26, %v55_v25  ;;  %v58_v32 = vld [vmem:[%s1371_s1 + $0x68] sm:$0xff]  ;;  %v313_v34 = vld [vmem:[%s1373_s2 + $0x40] sm:$0xff] }
   0x9   :  { %1005 = vmatpush3.bf16.msra.mxu0 %v1002_v5  ;;  %1035 = vmatprep.subr.bf16.mxu1 %v1034_v21  ;;  %v1042_v33 = vpack.c.bf16 %v312_v29, %v311_v28  ;;  %v314_v35 = vld [vmem:[%s1373_s2 + $0x48] sm:$0xff]  ;;  %v1022_v36 = vpack.c.bf16 %v58_v32, %v57_v31  ;;  %v59_v37 = vld [vmem:[%s1371_s1 + $0x70] sm:$0xff]  ;;  %v60_v38 = vld [vmem:[%s1371_s1 + $0x78] sm:$0xff] }
   0xa   :  { %1007 = vmatprep.subr.bf16.mxu0 %v1006_v8  ;;  %v1046_v39 = vpack.c.bf16 %v314_v35, %v313_v34  ;;  %v315_v40 = vld [vmem:[%s1373_s2 + $0x50] sm:$0xff]  ;;  %v316_v41 = vld [vmem:[%s1373_s2 + $0x58] sm:$0xff]  ;;  %v1026_v42 = vpack.c.bf16 %v60_v38, %v59_v37  ;;  %v317_v44 = vld [vmem:[%s1373_s2 + $0x60] sm:$0xff] }
   0xb   :  { %v1050_v43 = vpack.c.bf16 %v316_v41, %v315_v40  ;;  %v318_v45 = vld [vmem:[%s1373_s2 + $0x68] sm:$0xff]  ;;  %v319_v49 = vld [vmem:[%s1373_s2 + $0x70] sm:$0xff]  ;;  %v320_v50 = vld [vmem:[%s1373_s2 + $0x78] sm:$0xff] }
   0xc   :  { %1037 = vmatpush3.bf16.msra.mxu1 %v1034_v21  ;;  %v727_v46 = vld [vmem:[%s1372_s0 + $0x8] sm:$0xff]   ;;  %v1054_v47 = vpack.c.bf16 %v318_v45, %v317_v44  ;;  %v728_v52 = vld [vmem:[%s1372_s0 + $0x10] sm:$0xff]   ;;  %v1058_v53 = vpack.c.bf16 %v320_v50, %v319_v49  ;;  %v729_v56 = vld [vmem:[%s1372_s0 + $0x18] sm:$0xff]  }
   0xd   :  { %1009 = vmatpush3.bf16.msra.mxu0 %v1006_v8  ;;  %1039 = vmatprep.subr.bf16.mxu1 %v1038_v27  ;;  %v701_v51 = vunpack.c.l.bf16 %v727_v46  ;;  %v702_v54 = vunpack.c.h.bf16 %v727_v46  ;;  %v705_v55 = vunpack.c.l.bf16 %v728_v52  ;;  %v706_v57 = vunpack.c.h.bf16 %v728_v52  ;;  %v730_v59 = vld [vmem:[%s1372_s0 + $0x20] sm:$0xff]   ;;  %v731_v62 = vld [vmem:[%s1372_s0 + $0x28] sm:$0xff]   ;;  %v732_v1 = vld [vmem:[%s1372_s0 + $0x30] sm:$0xff]  }
   0xe   :  { %1011 = vmatprep.subr.bf16.mxu0 %v1010_v16  ;;  %v709_v58 = vunpack.c.l.bf16 %v729_v56  ;;  %v710_v60 = vunpack.c.h.bf16 %v729_v56  ;;  %v713_v61 = vunpack.c.l.bf16 %v730_v59  ;;  %v714_v63 = vunpack.c.h.bf16 %v730_v59  ;;  %v733_v4 = vld [vmem:[%s1372_s0 + $0x38] sm:$0xff]   ;;  %v489_v8 = vld [vmem:[%s1374_s4] sm:$0xff]  ;;  %v490_v9 = vld [vmem:[%s1374_s4 + $0x8] sm:$0xff] }
   0xf   :  { %v717_v0 = vunpack.c.l.bf16 %v731_v62  ;;  %v718_v2 = vunpack.c.h.bf16 %v731_v62  ;;  %v721_v3 = vunpack.c.l.bf16 %v732_v1  ;;  %v722_v5 = vunpack.c.h.bf16 %v732_v1  ;;  %v491_v10 = vld [vmem:[%s1374_s4 + $0x10] sm:$0xff]  ;;  %v492_v12 = vld [vmem:[%s1374_s4 + $0x18] sm:$0xff]  ;;  %v493_v14 = vld [vmem:[%s1374_s4 + $0x20] sm:$0xff] }
  0x10   :  { %1041 = vmatpush3.bf16.msra.mxu1 %v1038_v27  ;;  %v725_v6 = vunpack.c.l.bf16 %v733_v4  ;;  %v726_v7 = vunpack.c.h.bf16 %v733_v4  ;;  %v1062_v11 = vpack.c.bf16 %v490_v9, %v489_v8  ;;  %v1066_v13 = vpack.c.bf16 %v492_v12, %v491_v10  ;;  %v494_v15 = vld [vmem:[%s1374_s4 + $0x28] sm:$0xff]  ;;  %v495_v17 = vld [vmem:[%s1374_s4 + $0x30] sm:$0xff]  ;;  %v496_v18 = vld [vmem:[%s1374_s4 + $0x38] sm:$0xff] }
  0x11   :  { %1013 = vmatpush3.bf16.msra.mxu0 %v1010_v16  ;;  %1043 = vmatprep.subr.bf16.mxu1 %v1042_v33  ;;  %v1070_v16 = vpack.c.bf16 %v494_v15, %v493_v14  ;;  %v1074_v19 = vpack.c.bf16 %v496_v18, %v495_v17  ;;  %v497_v20 = vld [vmem:[%s1374_s4 + $0x40] sm:$0xff]  ;;  %v498_v21 = vld [vmem:[%s1374_s4 + $0x48] sm:$0xff]  ;;  %v499_v23 = vld [vmem:[%s1374_s4 + $0x50] sm:$0xff] }
  0x12   :  { %1015 = vmatprep.subr.bf16.mxu0 %v1014_v24  ;;  %v1078_v22 = vpack.c.bf16 %v498_v21, %v497_v20  ;;  %v501_v26 = vld [vmem:[%s1374_s4 + $0x60] sm:$0xff]  ;;  %v502_v27 = vld [vmem:[%s1374_s4 + $0x68] sm:$0xff]  ;;  %v503_v45 = vld [vmem:[%s1374_s4 + $0x70] sm:$0xff] }
  0x13   :  { %v1086_v28 = vpack.c.bf16 %v502_v27, %v501_v26  ;;  %v504_v46 = vld [vmem:[%s1374_s4 + $0x78] sm:$0xff] }
  0x14   :  { %1045 = vmatpush3.bf16.msra.mxu1 %v1042_v33 }
  0x15   :  { %1017 = vmatpush3.bf16.msra.mxu0 %v1014_v24  ;;  %1047 = vmatprep.subr.bf16.mxu1 %v1046_v39  ;;  %v500_v24 = vld [vmem:[%s1374_s4 + $0x58] sm:$0xff] }
  0x16   :  { %1019 = vmatprep.subr.bf16.mxu0 %v1018_v30  ;;  %v1082_v25 = vpack.c.bf16 %v500_v24, %v499_v23 }
  0x18   :  { %1049 = vmatpush3.bf16.msra.mxu1 %v1046_v39 }
  0x19   :  { %1021 = vmatpush3.bf16.msra.mxu0 %v1018_v30  ;;  %1051 = vmatprep.subr.bf16.mxu1 %v1050_v43 }
  0x1a   :  { %1023 = vmatprep.subr.bf16.mxu0 %v1022_v36 }
  0x1c   :  { %1053 = vmatpush3.bf16.msra.mxu1 %v1050_v43 }
  0x1d   :  { %1025 = vmatpush3.bf16.msra.mxu0 %v1022_v36  ;;  %1055 = vmatprep.subr.bf16.mxu1 %v1054_v47 }
  0x1e   :  { %1027 = vmatprep.subr.bf16.mxu0 %v1026_v42 }
  0x20   :  { %1057 = vmatpush3.bf16.msra.mxu1 %v1054_v47  ;;  %v1090_v47 = vpack.c.bf16 %v504_v46, %v503_v45 }
  0x21   :  { %1029 = vmatpush3.bf16.msra.mxu0 %v1026_v42  ;;  %1059 = vmatprep.subr.bf16.mxu1 %v1058_v53 }
  0x22   :  { %1063 = vmatprep.subr.bf16.mxu0 %v1062_v11 }
  0x24   :  { %863 = vmatmul.mubr.f32.vlgmr.msra.gmra.mrb[0].mxu0 %v698_v48  ;;  %1061 = vmatpush3.bf16.msra.mxu1 %v1058_v53  ;;  %v693_v48 = vld [vmem:[%s1375_s3] ss:$0 sm:$0xff] }
  0x25   :  { %865 = vmatprep.mubr.f32.mxu0 %v701_v51  ;;  %1094 = vmatprep.subr.bf16.mxu1 %v1062_v11 }
  0x26   :  { %1065 = vmatpush3.bf16.msra.mxu0 %v1062_v11 }
  0x27   :  { %1067 = vmatprep.subr.bf16.mxu0 %v1066_v13 }
  0x28   :  { %866 = vmatmul.mubr.f32.gmra.mrb[2].mxu0 %v702_v54 }
  0x29   :  { %868 = vmatprep.mubr.f32.mxu0 %v705_v55 }
  0x2a   :  { %1069 = vmatpush3.bf16.msra.mxu0 %v1066_v13 }
  0x2b   :  { %1071 = vmatprep.subr.bf16.mxu0 %v1070_v16 }
  0x2c   :  { %869 = vmatmul.mubr.f32.gmra.mrb[4].mxu0 %v706_v57 }
  0x2d   :  { %871 = vmatprep.mubr.f32.mxu0 %v709_v58 }
  0x2e   :  { %1073 = vmatpush3.bf16.msra.mxu0 %v1070_v16 }
  0x2f   :  { %1075 = vmatprep.subr.bf16.mxu0 %v1074_v19 }
  0x30   :  { %872 = vmatmul.mubr.f32.gmra.mrb[6].mxu0 %v710_v60 }
  0x31   :  { %874 = vmatprep.mubr.f32.mxu0 %v713_v61 }
  0x32   :  { %1077 = vmatpush3.bf16.msra.mxu0 %v1074_v19 }
  0x33   :  { %1079 = vmatprep.subr.bf16.mxu0 %v1078_v22 }
  0x34   :  { %875 = vmatmul.mubr.f32.gmra.mrb[8].mxu0 %v714_v63 }
  0x35   :  { %877 = vmatprep.mubr.f32.mxu0 %v717_v0 }
  0x36   :  { %1081 = vmatpush3.bf16.msra.mxu0 %v1078_v22 }
  0x37   :  { %1083 = vmatprep.subr.bf16.mxu0 %v1082_v25 }
  0x38   :  { %878 = vmatmul.mubr.f32.gmra.mrb[10].mxu0 %v718_v2 }
  0x39   :  { %880 = vmatprep.mubr.f32.mxu0 %v721_v3 }
  0x3a   :  { %1085 = vmatpush3.bf16.msra.mxu0 %v1082_v25 }
  0x3b   :  { %1087 = vmatprep.subr.bf16.mxu0 %v1086_v28 }
  0x3c   :  { %881 = vmatmul.mubr.f32.gmra.mrb[12].mxu0 %v722_v5 }
  0x3d   :  { %883 = vmatprep.mubr.f32.mxu0 %v725_v6 }
  0x3e   :  { %1089 = vmatpush3.bf16.msra.mxu0 %v1086_v28 }
  0x3f   :  { %1091 = vmatprep.subr.bf16.mxu0 %v1090_v47 }
  0x40   :  { %884 = vmatmul.mubr.f32.gmra.mrb[14].mxu0 %v726_v7 }
  0x42   :  { %1093 = vmatpush3.bf16.msra.mxu0 %v1090_v47 }
  0xf7   :  { %v864_v29 = vpop.f32.mrb[0].mxu0 }
  0xf8   :  { %v175_v30 = vpop.f32.mrb[1].mxu0 }
  0xf9   :  { %918 = vmatprep.mubr.f32.mxu1 %v175_v30 }
  0xfa   :  { %919 = vmatmul.mubr.f32.vlgmr.msra.gmra.mrb[0].mxu1 %v864_v29 }
  0xfb   :  { %v867_v31 = vpop.f32.mrb[2].mxu0  ;;  %1102 = vmatpush3.bf16.msra.mxu1 %v1062_v11 }
  0xfc   :  { %v185_v32 = vpop.f32.mrb[3].mxu0  ;;  %1095 = vmatprep.subr.bf16.mxu1 %v1066_v13 }
  0xfd   :  { %921 = vmatprep.mubr.f32.mxu1 %v185_v32 }
  0xfe   :  { %922 = vmatmul.mubr.f32.gmra.mrb[2].mxu1 %v867_v31 }
  0xff   :  { %v870_v33 = vpop.f32.mrb[4].mxu0  ;;  %1103 = vmatpush3.bf16.msra.mxu1 %v1066_v13 }
 0x100   :  { %v195_v34 = vpop.f32.mrb[5].mxu0  ;;  %1096 = vmatprep.subr.bf16.mxu1 %v1070_v16 }
 0x101   :  { %924 = vmatprep.mubr.f32.mxu1 %v195_v34 }
 0x102   :  { %925 = vmatmul.mubr.f32.gmra.mrb[4].mxu1 %v870_v33  ;;  %v694_v33 = vld [vmem:[%s1376_s5] ss:$0 sm:$0xff] }
 0x103   :  { %v873_v35 = vpop.f32.mrb[6].mxu0  ;;  %1104 = vmatpush3.bf16.msra.mxu1 %v1070_v16 }
 0x104   :  { %v205_v36 = vpop.f32.mrb[7].mxu0  ;;  %1097 = vmatprep.subr.bf16.mxu1 %v1074_v19 }
 0x105   :  { %927 = vmatprep.mubr.f32.mxu1 %v205_v36 }
 0x106   :  { %928 = vmatmul.mubr.f32.gmra.mrb[6].mxu1 %v873_v35 }
 0x107   :  { %v876_v37 = vpop.f32.mrb[8].mxu0  ;;  %1105 = vmatpush3.bf16.msra.mxu1 %v1074_v19 }
 0x108   :  { %v215_v38 = vpop.f32.mrb[9].mxu0  ;;  %1098 = vmatprep.subr.bf16.mxu1 %v1078_v22 }
 0x109   :  { %930 = vmatprep.mubr.f32.mxu1 %v215_v38 }
 0x10a   :  { %931 = vmatmul.mubr.f32.gmra.mrb[8].mxu1 %v876_v37 }
 0x10b   :  { %v879_v39 = vpop.f32.mrb[10].mxu0  ;;  %1106 = vmatpush3.bf16.msra.mxu1 %v1078_v22 }
 0x10c   :  { %v225_v40 = vpop.f32.mrb[11].mxu0  ;;  %1099 = vmatprep.subr.bf16.mxu1 %v1082_v25 }
 0x10d   :  { %933 = vmatprep.mubr.f32.mxu1 %v225_v40 }
 0x10e   :  { %934 = vmatmul.mubr.f32.gmra.mrb[10].mxu1 %v879_v39 }
 0x10f   :  { %v882_v41 = vpop.f32.mrb[12].mxu0  ;;  %1107 = vmatpush3.bf16.msra.mxu1 %v1082_v25 }
 0x110   :  { %v235_v42 = vpop.f32.mrb[13].mxu0  ;;  %1100 = vmatprep.subr.bf16.mxu1 %v1086_v28 }
 0x111   :  { %936 = vmatprep.mubr.f32.mxu1 %v235_v42 }
 0x112   :  { %937 = vmatmul.mubr.f32.gmra.mrb[12].mxu1 %v882_v41 }
 0x113   :  { %v885_v43 = vpop.f32.mrb[14].mxu0  ;;  %1108 = vmatpush3.bf16.msra.mxu1 %v1086_v28 }
 0x114   :  { %v245_v44 = vpop.f32.mrb[15].mxu0  ;;  %1101 = vmatprep.subr.bf16.mxu1 %v1090_v47 }
 0x115   :  { %939 = vmatprep.mubr.f32.mxu1 %v245_v44 }
 0x116   :  { %940 = vmatmul.mubr.f32.gmra.mrb[14].mxu1 %v885_v43 }
 0x117   :  { %1109 = vmatpush3.bf16.msra.mxu1 %v1090_v47 }
 0x1cd   :  { %v920_v49 = vpop.f32.mrb[0].mxu1 }
 0x1ce   :  { %v400_v50 = vadd.f32 %v920_v49, %v693_v48  ;;  %v394_v51 = vpop.f32.mrb[1].mxu1 }
 0x1cf   :  { %v395_v52 = vadd.f32 %v693_v48, %v394_v51 }
 0x1d0   :  { %v474_v55 = vmax.f32 %v400_v50, 0.0 }
 0x1d1   :  { %v473_v53 = vmax.f32 %v395_v52, 0.0  ;;  %v923_v54 = vpop.f32.mrb[2].mxu1 }
 0x1d2   :  { %v410_v56 = vadd.f32 %v923_v54, %v693_v48  ;;  %v404_v57 = vpop.f32.mrb[3].mxu1 }
 0x1d3   :  { %v405_v58 = vadd.f32 %v693_v48, %v404_v57  ;;  %974 = vmatprep.mubr.f32.mxu0 %v473_v53 }
 0x1d4   :  { %975 = vmatmul.mubr.f32.vlgmr.msra.gmra.mrb[16].mxu0 %v474_v55  ;;  %v476_v61 = vmax.f32 %v410_v56, 0.0 }
 0x1d5   :  { %v475_v59 = vmax.f32 %v405_v58, 0.0  ;;  %v926_v60 = vpop.f32.mrb[4].mxu1 }
 0x1d6   :  { %v420_v62 = vadd.f32 %v926_v60, %v693_v48  ;;  %v414_v63 = vpop.f32.mrb[5].mxu1 }
 0x1d7   :  { %v415_v0 = vadd.f32 %v693_v48, %v414_v63  ;;  %977 = vmatprep.mubr.f32.mxu0 %v475_v59 }
 0x1d8   :  { %978 = vmatmul.mubr.f32.gmra.mrb[18].mxu0 %v476_v61  ;;  %v478_v3 = vmax.f32 %v420_v62, 0.0 }
 0x1d9   :  { %v477_v1 = vmax.f32 %v415_v0, 0.0  ;;  %v929_v2 = vpop.f32.mrb[6].mxu1 }
 0x1da   :  { %v430_v4 = vadd.f32 %v929_v2, %v693_v48  ;;  %v424_v5 = vpop.f32.mrb[7].mxu1 }
 0x1db   :  { %v425_v6 = vadd.f32 %v693_v48, %v424_v5  ;;  %980 = vmatprep.mubr.f32.mxu0 %v477_v1 }
 0x1dc   :  { %981 = vmatmul.mubr.f32.gmra.mrb[20].mxu0 %v478_v3  ;;  %v480_v9 = vmax.f32 %v430_v4, 0.0 }
 0x1dd   :  { %v479_v7 = vmax.f32 %v425_v6, 0.0  ;;  %v932_v8 = vpop.f32.mrb[8].mxu1 }
 0x1de   :  { %v440_v10 = vadd.f32 %v932_v8, %v693_v48  ;;  %v434_v11 = vpop.f32.mrb[9].mxu1 }
 0x1df   :  { %v435_v12 = vadd.f32 %v693_v48, %v434_v11  ;;  %983 = vmatprep.mubr.f32.mxu0 %v479_v7 }
 0x1e0   :  { %984 = vmatmul.mubr.f32.gmra.mrb[22].mxu0 %v480_v9  ;;  %v482_v15 = vmax.f32 %v440_v10, 0.0 }
 0x1e1   :  { %v481_v13 = vmax.f32 %v435_v12, 0.0  ;;  %v935_v14 = vpop.f32.mrb[10].mxu1 }
 0x1e2   :  { %v450_v16 = vadd.f32 %v935_v14, %v693_v48  ;;  %v444_v17 = vpop.f32.mrb[11].mxu1 }
 0x1e3   :  { %v445_v18 = vadd.f32 %v693_v48, %v444_v17  ;;  %986 = vmatprep.mubr.f32.mxu1 %v481_v13 }
 0x1e4   :  { %987 = vmatmul.mubr.f32.vlgmr.msra.gmra.mrb[16].mxu1 %v482_v15  ;;  %v484_v21 = vmax.f32 %v450_v16, 0.0 }
 0x1e5   :  { %v483_v19 = vmax.f32 %v445_v18, 0.0  ;;  %v938_v20 = vpop.f32.mrb[12].mxu1 }
 0x1e6   :  { %v460_v22 = vadd.f32 %v938_v20, %v693_v48  ;;  %v454_v23 = vpop.f32.mrb[13].mxu1 }
 0x1e7   :  { %v455_v24 = vadd.f32 %v693_v48, %v454_v23  ;;  %989 = vmatprep.mubr.f32.mxu1 %v483_v19 }
 0x1e8   :  { %990 = vmatmul.mubr.f32.gmra.mrb[18].mxu1 %v484_v21  ;;  %v486_v27 = vmax.f32 %v460_v22, 0.0 }
 0x1e9   :  { %v485_v25 = vmax.f32 %v455_v24, 0.0  ;;  %v941_v26 = vpop.f32.mrb[14].mxu1 }
 0x1ea   :  { %v470_v28 = vadd.f32 %v941_v26, %v693_v48  ;;  %v464_v29 = vpop.f32.mrb[15].mxu1 }
 0x1eb   :  { %v465_v30 = vadd.f32 %v693_v48, %v464_v29  ;;  %992 = vmatprep.mubr.f32.mxu1 %v485_v25 }
 0x1ec   :  { %993 = vmatmul.mubr.f32.gmra.mrb[20].mxu1 %v486_v27  ;;  %v488_v32 = vmax.f32 %v470_v28, 0.0 }
 0x1ed   :  { %v487_v31 = vmax.f32 %v465_v30, 0.0 }
 0x1ef   :  { %995 = vmatprep.mubr.f32.mxu1 %v487_v31 }
 0x1f0   :  { %996 = vmatmul.mubr.f32.gmra.mrb[22].mxu1 %v488_v32 }
 0x2a7   :  { %v976_v34 = vpop.f32.mrb[16].mxu0 }
 0x2a8   :  { %v584_v35 = vadd.f32 %v976_v34, %v694_v33  ;;  %v578_v36 = vpop.f32.mrb[17].mxu0 }
 0x2a9   :  { %v579_v37 = vadd.f32 %v694_v33, %v578_v36 }
 0x2aa   :  { %v658_v38 = vmax.f32 %v584_v35, 0.0 }
 0x2ab   :  { %v657_v39 = vmax.f32 %v579_v37, 0.0  ;;  %v979_v40 = vpop.f32.mrb[18].mxu0 }
 0x2ac   :  { %674 = vst [vmem:[%s1377_s6 + $0x8] sm:$0xff] %v658_v38  ;;  %v594_v41 = vadd.f32 %v979_v40, %v694_v33  ;;  %v588_v42 = vpop.f32.mrb[19].mxu0 }
 0x2ad   :  { %673 = vst [vmem:[%s1377_s6] sm:$0xff] %v657_v39  ;;  %v589_v43 = vadd.f32 %v694_v33, %v588_v42 }
 0x2ae   :  { %v660_v44 = vmax.f32 %v594_v41, 0.0 }
 0x2af   :  { %v659_v45 = vmax.f32 %v589_v43, 0.0  ;;  %v982_v46 = vpop.f32.mrb[20].mxu0 }
 0x2b0   :  { %676 = vst [vmem:[%s1377_s6 + $0x18] sm:$0xff] %v660_v44  ;;  %v604_v47 = vadd.f32 %v982_v46, %v694_v33  ;;  %v598_v48 = vpop.f32.mrb[21].mxu0 }
 0x2b1   :  { %675 = vst [vmem:[%s1377_s6 + $0x10] sm:$0xff] %v659_v45  ;;  %v599_v49 = vadd.f32 %v694_v33, %v598_v48 }
 0x2b2   :  { %v662_v50 = vmax.f32 %v604_v47, 0.0 }
 0x2b3   :  { %v661_v51 = vmax.f32 %v599_v49, 0.0  ;;  %v985_v52 = vpop.f32.mrb[22].mxu0 }
 0x2b4   :  { %678 = vst [vmem:[%s1377_s6 + $0x28] sm:$0xff] %v662_v50  ;;  %v614_v53 = vadd.f32 %v985_v52, %v694_v33  ;;  %v608_v54 = vpop.f32.mrb[23].mxu0 }
 0x2b5   :  { %677 = vst [vmem:[%s1377_s6 + $0x20] sm:$0xff] %v661_v51  ;;  %v609_v55 = vadd.f32 %v694_v33, %v608_v54 }
 0x2b6   :  { %v664_v56 = vmax.f32 %v614_v53, 0.0 }
 0x2b7   :  { %v663_v57 = vmax.f32 %v609_v55, 0.0  ;;  %v988_v58 = vpop.f32.mrb[16].mxu1 }
 0x2b8   :  { %680 = vst [vmem:[%s1377_s6 + $0x38] sm:$0xff] %v664_v56  ;;  %v624_v59 = vadd.f32 %v988_v58, %v694_v33  ;;  %v618_v60 = vpop.f32.mrb[17].mxu1 }
 0x2b9   :  { %679 = vst [vmem:[%s1377_s6 + $0x30] sm:$0xff] %v663_v57  ;;  %v619_v61 = vadd.f32 %v694_v33, %v618_v60 }
 0x2ba   :  { %v666_v62 = vmax.f32 %v624_v59, 0.0 }
 0x2bb   :  { %v665_v63 = vmax.f32 %v619_v61, 0.0  ;;  %v991_v0 = vpop.f32.mrb[18].mxu1 }
 0x2bc   :  { %682 = vst [vmem:[%s1377_s6 + $0x48] sm:$0xff] %v666_v62  ;;  %v634_v1 = vadd.f32 %v991_v0, %v694_v33  ;;  %v628_v2 = vpop.f32.mrb[19].mxu1 }
 0x2bd   :  { %681 = vst [vmem:[%s1377_s6 + $0x40] sm:$0xff] %v665_v63  ;;  %v629_v3 = vadd.f32 %v694_v33, %v628_v2 }
 0x2be   :  { %v668_v4 = vmax.f32 %v634_v1, 0.0 }
 0x2bf   :  { %v667_v5 = vmax.f32 %v629_v3, 0.0  ;;  %v994_v6 = vpop.f32.mrb[20].mxu1 }
 0x2c0   :  { %684 = vst [vmem:[%s1377_s6 + $0x58] sm:$0xff] %v668_v4  ;;  %v644_v7 = vadd.f32 %v994_v6, %v694_v33  ;;  %v638_v8 = vpop.f32.mrb[21].mxu1 }
 0x2c1   :  { %683 = vst [vmem:[%s1377_s6 + $0x50] sm:$0xff] %v667_v5  ;;  %v639_v9 = vadd.f32 %v694_v33, %v638_v8 }
 0x2c2   :  { %v670_v10 = vmax.f32 %v644_v7, 0.0 }
 0x2c3   :  { %v669_v11 = vmax.f32 %v639_v9, 0.0  ;;  %v997_v12 = vpop.f32.mrb[22].mxu1 }
 0x2c4   :  { %686 = vst [vmem:[%s1377_s6 + $0x68] sm:$0xff] %v670_v10  ;;  %v654_v13 = vadd.f32 %v997_v12, %v694_v33  ;;  %v648_v14 = vpop.f32.mrb[23].mxu1 }
 0x2c5   :  { %685 = vst [vmem:[%s1377_s6 + $0x60] sm:$0xff] %v669_v11  ;;  %v649_v15 = vadd.f32 %v694_v33, %v648_v14 }
 0x2c6   :  { %v672_v16 = vmax.f32 %v654_v13, 0.0 }
 0x2c7   :  { %v671_v17 = vmax.f32 %v649_v15, 0.0 }
 0x2c8   :  { %688 = vst [vmem:[%s1377_s6 + $0x78] sm:$0xff] %v672_v16 }
 0x2c9   :  { %687 = vst [vmem:[%s1377_s6 + $0x70] sm:$0xff] %v671_v17 }

</bundles_post_ra>
